<compile_context>
chip_gen: v5e
topology: v5e:2x2
jax: 0.10.0
libtpu: 0.0.40
codegen_flags: <defaults>
</compile_context>

<pallas_src>
import functools

import jax
import jax.numpy as jnp
from jax.experimental import pallas as pl
from jax.experimental.pallas import tpu as pltpu

BATCH = 256          # 2 grid steps of 128 rows -> full MXU pass per step
IN_FEATURES = 128
OUT_FEATURES = 128
DROPOUT_P = 0.5


def dropout_linear_kernel(x_ref, m_ref, w_ref, b_ref, o_ref, *, inv_keep):
    # Dropout: zero the dropped elements.  Element-wise math stays in f32
    # (v5e VPU has no bf16); the 1/(1-p) scale is applied after the matmul.
    x_dropped = x_ref[...] * m_ref[...]

    # Wrapped module (Linear) on the MXU: bf16 inputs, f32 accumulation.
    acc = jnp.dot(x_dropped.astype(jnp.bfloat16), w_ref[...],
                  preferred_element_type=jnp.float32)

    o_ref[...] = acc * jnp.float32(inv_keep) + b_ref[...]


def dropout_prefix_linear(x, w_bf16, b, keep_mask, *, p=DROPOUT_P):
    """x: [B, IN] f32, w_bf16: [IN, OUT] bf16, b: [1, OUT] f32,
    keep_mask: [B, IN] f32 in {0, 1}."""
    B, IN = x.shape
    IN2, OUT = w_bf16.shape
    assert IN == IN2 and keep_mask.shape == x.shape

    # Batch tile: 128 rows fills an MXU pass; fall back to full B if uneven.
    TB = 128 if (B % 128 == 0) else B
    grid = (B // TB,)

    kernel = functools.partial(dropout_linear_kernel, inv_keep=1.0 / (1.0 - p))

    flops = 2 * B * IN * OUT
    bytes_accessed = (x.size * 4 + keep_mask.size * 4 + w_bf16.size * 2
                      + b.size * 4 + B * OUT * 4)

    return pl.pallas_call(
        kernel,
        out_shape=jax.ShapeDtypeStruct((B, OUT), jnp.float32),
        grid=grid,
        in_specs=[
            pl.BlockSpec((TB, IN), lambda i: (i, 0)),    # x tile (pipelined)
            pl.BlockSpec((TB, IN), lambda i: (i, 0)),    # keep-mask tile
            pl.BlockSpec((IN, OUT), lambda i: (0, 0)),   # W: VMEM-resident
            pl.BlockSpec((1, OUT), lambda i: (0, 0)),    # bias: VMEM-resident
        ],
        out_specs=pl.BlockSpec((TB, OUT), lambda i: (i, 0)),
        compiler_params=pltpu.CompilerParams(
            dimension_semantics=("parallel",)),          # shard over both TCs on v7x
        cost_estimate=pl.CostEstimate(
            flops=flops, bytes_accessed=bytes_accessed, transcendentals=0),
    )(x, keep_mask, w_bf16, b)


if __name__ == "__main__":
    key = jax.random.PRNGKey(0)
    kx, kw, kb, kd = jax.random.split(key, 4)

    # Deterministic synthetic parameters for the wrapped Linear module.
    x = jax.random.normal(kx, (BATCH, IN_FEATURES), dtype=jnp.float32)
    w = (jax.random.normal(kw, (IN_FEATURES, OUT_FEATURES), dtype=jnp.float32)
         * (1.0 / jnp.sqrt(IN_FEATURES)))
    b = jax.random.normal(kb, (1, OUT_FEATURES), dtype=jnp.float32) * 0.01

    # Training-mode dropout keep mask (p = 0.5), drawn once outside the kernel.
    keep = jax.random.bernoulli(
        kd, 1.0 - DROPOUT_P, (BATCH, IN_FEATURES)).astype(jnp.float32)

    w_bf16 = w.astype(jnp.bfloat16)   # one-time param cast (bf16 MXU inputs)

    out = dropout_prefix_linear(x, w_bf16, b, keep)
    out = jax.block_until_ready(out)

    assert out.shape == (BATCH, OUT_FEATURES)
    assert out.dtype == jnp.float32

    # Reference: same bf16-input / f32-accumulate math the kernel performs.
    ref = (jnp.dot((x * keep).astype(jnp.bfloat16), w_bf16,
                   preferred_element_type=jnp.float32)
           * jnp.float32(1.0 / (1.0 - DROPOUT_P)) + b)
    assert jnp.allclose(out, ref, atol=1e-2, rtol=1e-2)

    print("KERNEL_OK")
</pallas_src>

<mosaic_0001>
module attributes {stable_mosaic.version = 11 : i64} {
  func.func @dropout_linear_kernel(%arg0: i32, %arg1: memref<128x128xf32, #tpu.memory_space<vmem>>, %arg2: memref<128x128xf32, #tpu.memory_space<vmem>>, %arg3: memref<128x128xbf16, #tpu.memory_space<vmem>>, %arg4: memref<1x128xf32, #tpu.memory_space<vmem>>, %arg5: memref<128x128xf32, #tpu.memory_space<vmem>>) attributes {dimension_semantics = [#tpu.dimension_semantics<parallel>], iteration_bounds = array<i64: 2>, scalar_prefetch = 0 : i64, scratch_operands = 0 : i64, tpu.core_type = #tpu.core_type<tc>, window_params = [{transform_indices = @transform_0, window_bounds = array<i64: 128, 128>}, {transform_indices = @transform_1, window_bounds = array<i64: 128, 128>}, {pipeline_mode = #tpu.pipeline_mode<synchronous>, transform_indices = @transform_2, window_bounds = array<i64: 128, 128>}, {pipeline_mode = #tpu.pipeline_mode<synchronous>, transform_indices = @transform_3, window_bounds = array<i64: 1, 128>}, {transform_indices = @transform_4, window_bounds = array<i64: 128, 128>}]} {
    %c0 = arith.constant 0 : index
    %c0_0 = arith.constant 0 : index
    %0 = vector.load %arg1[%c0, %c0_0] : memref<128x128xf32, #tpu.memory_space<vmem>>, vector<128x128xf32>
    %c0_1 = arith.constant 0 : index
    %c0_2 = arith.constant 0 : index
    %1 = vector.load %arg2[%c0_1, %c0_2] : memref<128x128xf32, #tpu.memory_space<vmem>>, vector<128x128xf32>
    %2 = arith.mulf %0, %1 : vector<128x128xf32>
    %3 = arith.truncf %2 : vector<128x128xf32> to vector<128x128xbf16>
    %c0_3 = arith.constant 0 : index
    %c0_4 = arith.constant 0 : index
    %4 = vector.load %arg3[%c0_3, %c0_4] : memref<128x128xbf16, #tpu.memory_space<vmem>>, vector<128x128xbf16>
    %cst = arith.constant dense<0.000000e+00> : vector<128x128xf32>
    %5 = tpu.matmul %3, %4, %cst {dimension_numbers = #tpu.dot_dimension_numbers<[1], [0], [0], [1], [0, 0, 1, 1], [], []>} : vector<128x128xbf16>, vector<128x128xbf16>, vector<128x128xf32> -> vector<128x128xf32>
    %cst_5 = arith.constant 2.000000e+00 : f32
    %6 = vector.broadcast %cst_5 : f32 to vector<128x128xf32>
    %7 = arith.mulf %5, %6 : vector<128x128xf32>
    %c0_6 = arith.constant 0 : index
    %c0_7 = arith.constant 0 : index
    %8 = vector.load %arg4[%c0_6, %c0_7] : memref<1x128xf32, #tpu.memory_space<vmem>>, vector<1x128xf32>
    %9 = vector.broadcast %8 : vector<1x128xf32> to vector<128x128xf32>
    %10 = arith.addf %7, %9 : vector<128x128xf32>
    %c0_8 = arith.constant 0 : index
    %c0_9 = arith.constant 0 : index
    %11 = vector.load %arg5[%c0_8, %c0_9] : memref<128x128xf32, #tpu.memory_space<vmem>>, vector<128x128xf32>
    tpu.vector_store %arg5[%c0_8, %c0_9], %10 {strides = array<i32>} : memref<128x128xf32, #tpu.memory_space<vmem>>, vector<128x128xf32>,
    return
  }
  func.func @transform_0(%arg0: i32) -> (i32, i32) {
    %c0_i32 = arith.constant 0 : i32
    %c0_i32_0 = arith.constant 0 : i32
    return %arg0, %c0_i32 : i32, i32
  }
  func.func @transform_1(%arg0: i32) -> (i32, i32) {
    %c0_i32 = arith.constant 0 : i32
    %c0_i32_0 = arith.constant 0 : i32
    return %arg0, %c0_i32 : i32, i32
  }
  func.func @transform_2(%arg0: i32) -> (i32, i32) {
    %c0_i32 = arith.constant 0 : i32
    %c0_i32_0 = arith.constant 0 : i32
    %c0_i32_1 = arith.constant 0 : i32
    return %c0_i32, %c0_i32_0 : i32, i32
  }
  func.func @transform_3(%arg0: i32) -> (i32, i32) {
    %c0_i32 = arith.constant 0 : i32
    %c0_i32_0 = arith.constant 0 : i32
    %c0_i32_1 = arith.constant 0 : i32
    return %c0_i32, %c0_i32_0 : i32, i32
  }
  func.func @transform_4(%arg0: i32) -> (i32, i32) {
    %c0_i32 = arith.constant 0 : i32
    %c0_i32_0 = arith.constant 0 : i32
    return %arg0, %c0_i32 : i32, i32
  }
}

</mosaic_0001>

<bundles_post_ra>
// kernel: tpu_custom_call.1
= control target key start
LH: loop header
LB: loop body
LE: loop exit
PB: predicated region body
PF: predicated region fallthrough
CT: control target
= control target key end

     0   :  { %s1223_s0 = inlined_call_operand.hbm [shape: f32[256,128], index: 0, kind: input, shape index: {}]   ;;  %s1224_s1 = inlined_call_operand.hbm [shape: f32[256,128], index: 1, kind: input, shape index: {}]   ;;  %s1225_s2 = inlined_call_operand.hbm [shape: bf16[128,128], index: 2, kind: input, shape index: {}]   ;;  %s1226_s3 = inlined_call_operand.vmem [shape: f32[1,128], index: 3, kind: input, shape index: {}]   ;;  %s1227_s4 = inlined_call_operand.hbm [shape: f32[256,128], index: 4, kind: output, shape index: {}]  }
   0x1   :  { %1228 = sst [smem:[#allocation14_spill]] %s1223_s0 }
   0x2   :  { %1229 = sst [smem:[#allocation15_spill]] %s1225_s2 }
   0x3   :  { %9 = vsyncpa [#allocation3], 0 }
   0x4   :  { %11 = vsyncpa [#allocation3 + $0x1], 0 }
   0x5   :  { %12 = vsyncpa [#allocation6], 0 }
   0x6   :  { %14 = vsyncpa [#allocation6 + $0x1], 0 }
   0x7   :  { %15 = vsyncpa [#allocation4], 0 }
   0x8   :  { %17 = vsyncpa [#allocation4 + $0x1], 0  ;;  %s975_s15 = smov 0   ;;  %s977_s16 = smov 0  }
   0x9   :  { %s979_s17 = smov 0   ;;  %s981_s18 = smov 0  }
   0xa LB: > { %s996_s19 = sadd.s32 4294967295, %s941_s18   ;;  %s621_s20 = sadd.s32 4294967294, %s941_s18   ;;  %s941_s18 = sphi %s981_s18, %s1243_s18   ;;  %s937_s17 = sphi %s979_s17, %s1242_s17   ;;  %s933_s16 = sphi %s977_s16, %s1241_s16   ;;  %s929_s15 = sphi %s975_s15, %s1240_s15  }
   0xb   : > { %p43_p0 = scmp.ne.s32.totalorder %s933_s16, %s929_s15  ;;  %p44_p1 = scmp.eq.s32.totalorder %s996_s19, 0 }
   0xc   : > { %p135_p2 = scmp.eq.s32.totalorder %s996_s19, 1  ;;  %p141_p3 = scmp.eq.s32.totalorder %s621_s20, 1 }
   0xd   : > { %p1005_p4 = por %p44_p1, %p43_p0  ;;  %p622_p5 = scmp.ge.s32.totalorder %s941_s18, 1 }
   0xe   : > { %p1010_p6 = por %p141_p3, %p43_p0  ;;  %p148_p7 = scmp.lt.s32.totalorder %s941_s18, 3 }
   0xf   : > { %s1232_s2 = sld [smem:[#allocation15_spill]]  ;;  %s943_s27 = smov [#allocation7]  }
  0x10   : > { %p1018_p8 = pnand %p622_p5, %p148_p7  ;;  %s161_s28 = sshll.u32 %s943_s27, 4  ;;  %s162_s28 = int_to_ptr.vmem [resolvable:$true] %s161_s28 }
  0x11   : > { %s1028_s29 = sadd.s32 1, %s941_s18   ;;  %s944_s30 = smov 64  }
  0x12   : > { %p718_p9 = pneg %p1018_p8  ;;  %s945_s5 = smov 4  }
  0x13   : > { %s27_s6 = ssub.s32 %s941_s18, %s1028_s29  ;;  %s30_s7 = sadd.s32 1, %s937_s17 }
  0x14   : > { %p719_p10 = pnand %p718_p9, %p44_p1  ;;  %p28_p12 = scmp.eq.s32.totalorder %s27_s6, 0 }
  0x15   : > { %s159_s25 = sshll.u32 %s1232_s2, 4  ;;  %p37_p13 = scmp.ne.s32.totalorder %s937_s17, %s933_s16  ;;  %s160_s25 = int_to_ptr.hbm [resolvable:$true] %s159_s25 }
  0x16   : > { %721 = dma.hbm_to_vmem [thread:$0]  (!%p719_p10), %s160_s25, 1024, %s162_s28, [#allocation6], %s944_s30, %s944_s30, %s945_s5  }
  0x17   : > { %p38_p0 = scmp.eq.s32.totalorder %s941_s18, 0  ;;  %p734_p3 = scmp.lt.s32.totalorder %s941_s18, 2 }
  0x18   : > { %s1038_s8 = scalar_select %p28_p12, %s937_s17, %s30_s7  }
  0x19   : > { %p39_p5 = por %p38_p0, %p37_p13  ;;  %p1042_p7 = por %p135_p2, %p37_p13 }
  0x1a   : > { %1234 = sst [smem:[#allocation13_spill]] %s1038_s8  ;;  %s178_s10 = sand.u32 1, %s937_s17  }
  0x1b   : > { %s673_s11 = sshll.u32 %s941_s18, 7  ;;  %s1048_s12 = sshll.u32 %s178_s10, 7 }
  0x1c   : > { %s1236_s0 = sld [smem:[#allocation14_spill]]  ;;  %s182_s24 = scalar_lea.vmem [#allocation2], %s1048_s12 }
  0x1d   : > { %s190_s25 = sshll.u32 %s182_s24, 4  ;;  %p1056_p9 = pnand %p734_p3, %p39_p5  ;;  %s191_s25 = int_to_ptr.vmem [resolvable:$true] %s190_s25 }
  0x1e   : > { %s209_s5 = scalar_lea.hbm %s1224_s1, %s673_s11  ;;  %s179_s6 = scalar_lea.sflag [#allocation3], %s178_s10 }
  0x1f   : > { %p811_p10 = pneg %p1056_p9 }
  0x22   : > { %s187_s20 = scalar_lea.hbm %s1236_s0, %s673_s11  ;;  %s814_s24 = scalar_lea.hbm %s1236_s0, 256 }
  0x23   : > { %s188_s23 = sshll.u32 %s187_s20, 4  ;;  %s189_s23 = int_to_ptr.hbm [resolvable:$true] %s188_s23 }
  0x24   : > { %s807_s7 = sshra.s32 %s189_s23, 4  ;;  %s808_s7 = int_to_ptr.hbm [resolvable:$true] %s807_s7 }
  0x25   : > { %s809_s13 = scalar_lea.hbm %s808_s7, 128  ;;  %p815_p0 = scmp.lt.s32.totalorder %s808_s7, %s1236_s0 }
  0x26   : > { %p810_p2 = scmp.ne.s32.totalorder %s808_s7, %s809_s13  ;;  %p816_p3 = scmp.lt.s32.totalorder %s814_s24, %s809_s13 }
  0x28   : > { %p812_p12 = pnand %p811_p10, %p810_p2  ;;  %p817_p5 = por %p816_p3, %p815_p0 }
  0x2a   : > { %p813_p13 = pneg %p812_p12 }
  0x2c   : > { %p818_p11 = pnand %p817_p5, %p813_p13 }
  0x2e   : > { %821 = shalt.err (!%p818_p11)
}
  0x2f   : > { %s946_s10 = smov 128   ;;  %s947_s11 = smov 8  }
  0x30   : > { %725 = dma.hbm_to_vmem [thread:$0]  (!%p1056_p9), %s189_s23, 2048, %s191_s25, %s179_s6, %s946_s10, %s946_s10, %s947_s11  }
  0x31   : > { %s210_s30 = sshll.u32 %s209_s5, 4  ;;  %s204_s8 = scalar_lea.vmem [#allocation5], %s1048_s12  ;;  %s211_s30 = int_to_ptr.hbm [resolvable:$true] %s210_s30 }
  0x32   : > { %s212_s14 = sshll.u32 %s204_s8, 4  ;;  %s200_s20 = sand.u32 1, %s941_s18   ;;  %s213_s14 = int_to_ptr.vmem [resolvable:$true] %s212_s14 }
  0x33   : > { %s201_s2 = scalar_lea.sflag [#allocation6], %s200_s20  ;;  %s837_s7 = sshra.s32 %s211_s30, 4  ;;  %s838_s7 = int_to_ptr.hbm [resolvable:$true] %s837_s7 }
  0x34   : > { %s839_s13 = scalar_lea.hbm %s838_s7, 128  ;;  %s844_s0 = scalar_lea.hbm %s1224_s1, 256 }
  0x35   : > { %p840_p2 = scmp.ne.s32.totalorder %s838_s7, %s839_s13  ;;  %p845_p13 = scmp.lt.s32.totalorder %s838_s7, %s1224_s1 }
  0x36   : > { %p846_p0 = scmp.lt.s32.totalorder %s844_s0, %s839_s13 }
  0x37   : > { %p842_p11 = pnand %p840_p2, %p811_p10 }
  0x38   : > { %p847_p3 = por %p846_p0, %p845_p13 }
  0x39   : > { %p843_p12 = pneg %p842_p11 }
  0x3b   : > { %p848_p5 = pnand %p847_p3, %p843_p12 }
  0x3d   : > { %851 = shalt.err (!%p848_p5)
}
  0x3e   : > { %728 = dma.hbm_to_vmem [thread:$0]  (!%p1056_p9), %s211_s30, 2048, %s213_s14, %s201_s2, %s946_s10, %s946_s10, %s947_s11  }
  0x3f   : > { %224 = sbr.rel (%p1018_p8) target bundleno = 272 (0x110), region = 36  ;;  %s1092_s8 = sand.u32 (!%p1018_p8), 1, %s933_s16  }
  0x40   : > { %s1095_s12 = sshll.u32 (!%p1018_p8), %s1092_s8, 7  ;;  %s227_s5 = scalar_lea.sflag (!%p1018_p8), [#allocation3], %s1092_s8 }
  0x41   : > { %s1099_s0 = scalar_lea.vmem (!%p1018_p8), [#allocation2], %s1095_s12 }
  0x44   : > { %912 = dma.done.wait (%p1005_p4), %s227_s5, 2048  }
  0x45   : > { %914 = vsyncadd (%p1005_p4), %s227_s5, 4294965248  ;;  %s236_s26 = sand.u32 1, %s996_s19   ;;  %s1107_s6 = scalar_lea.vmem [#allocation5], %s1095_s12 }
  0x46   : > { %s237_s27 = scalar_lea.sflag [#allocation6], %s236_s26 }
  0x47   : > { %916 = dma.done.wait (%p1005_p4), %s237_s27, 2048  }
  0x48   : > { %918 = vsyncadd (%p1005_p4), %s237_s27, 4294965248 }
  0x49   : > { %920 = dma.done.wait (%p44_p1), [#allocation6], 1024  }
  0x4a   : > { %922 = vsyncadd (%p44_p1), [#allocation6], 4294966272  ;;  %v682_v0 = vld [vmem:[#allocation7 + $0x38] sm:$0xff]  ;;  %v681_v1 = vld [vmem:[#allocation7 + $0x30] sm:$0xff]  ;;  %s1157_s11 = scalar_lea.vmem [#allocation8], %s1095_s12  ;;  %s683_s30 = sshll.u32 %s996_s19, 7 }
  0x4b   : > { %399 = vmatpush.bf16.msra.mxu0 %v682_v0  ;;  %684 = vmatpush.bf16.msra.mxu1 %v682_v0  ;;  %v680_v2 = vld [vmem:[#allocation7 + $0x28] sm:$0xff]  ;;  %v679_v3 = vld [vmem:[#allocation7 + $0x20] sm:$0xff]  ;;  %v678_v4 = vld [vmem:[#allocation7 + $0x18] sm:$0xff]  ;;  %s512_s2 = scalar_lea.hbm %s1227_s4, %s683_s30  ;;  %s513_s19 = sshll.u32 %s1157_s11, 4  ;;  %s514_s19 = int_to_ptr.vmem [resolvable:$true] %s513_s19 }
  0x4c   : > { %685 = vmatpush.bf16.msra.mxu2 %v682_v0  ;;  %686 = vmatpush.bf16.msra.mxu3 %v682_v0  ;;  %v677_v5 = vld [vmem:[#allocation7 + $0x10] sm:$0xff]  ;;  %v279_v6 = vld [vmem:[%s1099_s0] sm:$0xff]  ;;  %v676_v8 = vld [vmem:[#allocation7 + $0x8] sm:$0xff]  ;;  %s515_s7 = sshll.u32 %s512_s2, 4  ;;  %s501_s13 = scalar_lea.sflag [#allocation4], %s1092_s8  ;;  %s516_s7 = int_to_ptr.hbm [resolvable:$true] %s515_s7 }
  0x4d   : > { %v295_v7 = vld [vmem:[%s1107_s6] sm:$0xff]  ;;  %v280_v9 = vld [vmem:[%s1099_s0 + $0x8] sm:$0xff]  ;;  %v281_v36 = vld [vmem:[%s1099_s0 + $0x10] sm:$0xff]  ;;  %s881_s24 = sshra.s32 %s516_s7, 4  ;;  %s887_s12 = scalar_lea.hbm %s1227_s4, 256  ;;  %s882_s24 = int_to_ptr.hbm [resolvable:$true] %s881_s24 }
  0x4e   : > { %v296_v10 = vld [vmem:[%s1107_s6 + $0x8] sm:$0xff]  ;;  %v283_v11 = vld [vmem:[%s1099_s0 + $0x20] sm:$0xff]  ;;  %v311_v23 = vmul.f32 %v295_v7, %v279_v6  ;;  %v282_v37 = vld [vmem:[%s1099_s0 + $0x18] sm:$0xff]  ;;  %s883_s28 = scalar_lea.hbm %s882_s24, 128  ;;  %p888_p9 = scmp.lt.s32.totalorder %s882_s24, %s1227_s4 }
  0x4f   : > { %400 = vmatpush.bf16.msra.mxu0 %v681_v1  ;;  %687 = vmatpush.bf16.msra.mxu1 %v681_v1  ;;  %v284_v12 = vld [vmem:[%s1099_s0 + $0x28] sm:$0xff]  ;;  %v299_v13 = vld [vmem:[%s1107_s6 + $0x20] sm:$0xff]  ;;  %v312_v24 = vmul.f32 %v296_v10, %v280_v9  ;;  %v297_v38 = vld [vmem:[%s1107_s6 + $0x10] sm:$0xff]  ;;  %p884_p1 = scmp.ne.s32.totalorder %s882_s24, %s883_s28  ;;  %p889_p10 = scmp.lt.s32.totalorder %s887_s12, %s883_s28 }
  0x50   : > { %688 = vmatpush.bf16.msra.mxu2 %v681_v1  ;;  %689 = vmatpush.bf16.msra.mxu3 %v681_v1  ;;  %v300_v14 = vld [vmem:[%s1107_s6 + $0x28] sm:$0xff]  ;;  %v287_v15 = vld [vmem:[%s1099_s0 + $0x40] sm:$0xff]  ;;  %v315_v25 = vmul.f32 %v299_v13, %v283_v11  ;;  %v298_v39 = vld [vmem:[%s1107_s6 + $0x18] sm:$0xff]  ;;  %v313_v52 = vmul.f32 %v297_v38, %v281_v36 }
  0x51   : > { %v288_v16 = vld [vmem:[%s1099_s0 + $0x48] sm:$0xff]  ;;  %v303_v17 = vld [vmem:[%s1107_s6 + $0x40] sm:$0xff]  ;;  %v316_v26 = vmul.f32 %v300_v14, %v284_v12  ;;  %v327_v32 = vpack.c.bf16 %v312_v24, %v311_v23  ;;  %v285_v40 = vld [vmem:[%s1099_s0 + $0x30] sm:$0xff]  ;;  %v314_v53 = vmul.f32 %v298_v39, %v282_v37  ;;  %p885_p4 = pnand %p884_p1, %p1042_p7  ;;  %p890_p2 = por %p889_p10, %p888_p9 }
  0x52   : > { %v304_v18 = vld [vmem:[%s1107_s6 + $0x48] sm:$0xff]  ;;  %v291_v19 = vld [vmem:[%s1099_s0 + $0x60] sm:$0xff]  ;;  %v319_v27 = vmul.f32 %v303_v17, %v287_v15  ;;  %v286_v41 = vld [vmem:[%s1099_s0 + $0x38] sm:$0xff] }
  0x53   : > { %401 = vmatpush.bf16.msra.mxu0 %v680_v2  ;;  %690 = vmatpush.bf16.msra.mxu1 %v680_v2  ;;  %v292_v20 = vld [vmem:[%s1099_s0 + $0x68] sm:$0xff]  ;;  %v307_v21 = vld [vmem:[%s1107_s6 + $0x60] sm:$0xff]  ;;  %v320_v29 = vmul.f32 %v304_v18, %v288_v16  ;;  %v329_v33 = vpack.c.bf16 %v316_v26, %v315_v25  ;;  %v301_v42 = vld [vmem:[%s1107_s6 + $0x30] sm:$0xff]  ;;  %v328_v60 = vpack.c.bf16 %v314_v53, %v313_v52  ;;  %p886_p8 = pneg %p885_p4 }
  0x54   : > { %691 = vmatpush.bf16.msra.mxu2 %v680_v2  ;;  %692 = vmatpush.bf16.msra.mxu3 %v680_v2  ;;  %v308_v22 = vld [vmem:[%s1107_s6 + $0x68] sm:$0xff]  ;;  %v675_v28 = vld [vmem:[#allocation7] sm:$0xff]  ;;  %v323_v30 = vmul.f32 %v307_v21, %v291_v19  ;;  %v302_v43 = vld [vmem:[%s1107_s6 + $0x38] sm:$0xff]  ;;  %v317_v54 = vmul.f32 %v301_v42, %v285_v40 }
  0x55   : > { %v324_v31 = vmul.f32 %v308_v22, %v292_v20  ;;  %v331_v34 = vpack.c.bf16 %v320_v29, %v319_v27  ;;  %v289_v44 = vld [vmem:[%s1099_s0 + $0x50] sm:$0xff]  ;;  %v290_v45 = vld [vmem:[%s1099_s0 + $0x58] sm:$0xff]  ;;  %v318_v55 = vmul.f32 %v302_v43, %v286_v41  ;;  %v1152_v0 = vld [vmem:[%s1226_s3] ss:$0 sm:$0xff]  ;;  %p891_p11 = pnand %p890_p2, %p886_p8 }
  0x56   : > { %v305_v46 = vld [vmem:[%s1107_s6 + $0x50] sm:$0xff]  ;;  %v306_v47 = vld [vmem:[%s1107_s6 + $0x58] sm:$0xff] }
  0x57   : > { %402 = vmatpush.bf16.msra.mxu0 %v679_v3  ;;  %693 = vmatpush.bf16.msra.mxu1 %v679_v3  ;;  %v333_v35 = vpack.c.bf16 %v324_v31, %v323_v30  ;;  %v293_v48 = vld [vmem:[%s1099_s0 + $0x70] sm:$0xff]  ;;  %v294_v49 = vld [vmem:[%s1099_s0 + $0x78] sm:$0xff]  ;;  %v321_v56 = vmul.f32 %v305_v46, %v289_v44  ;;  %v322_v57 = vmul.f32 %v306_v47, %v290_v45 }
  0x58   : > { %694 = vmatpush.bf16.msra.mxu2 %v679_v3  ;;  %695 = vmatpush.bf16.msra.mxu3 %v679_v3  ;;  %v309_v50 = vld [vmem:[%s1107_s6 + $0x70] sm:$0xff]  ;;  %v310_v51 = vld [vmem:[%s1107_s6 + $0x78] sm:$0xff]  ;;  %v330_v61 = vpack.c.bf16 %v318_v55, %v317_v54 }
  0x59   : > { %v325_v58 = vmul.f32 %v309_v50, %v293_v48  ;;  %v326_v59 = vmul.f32 %v310_v51, %v294_v49  ;;  %v332_v62 = vpack.c.bf16 %v322_v57, %v321_v56 }
  0x5b   : > { %403 = vmatpush.bf16.msra.mxu0 %v678_v4  ;;  %696 = vmatpush.bf16.msra.mxu1 %v678_v4  ;;  %v334_v63 = vpack.c.bf16 %v326_v59, %v325_v58 }
  0x5c   : > { %697 = vmatpush.bf16.msra.mxu2 %v678_v4  ;;  %698 = vmatpush.bf16.msra.mxu3 %v678_v4 }
  0x5f   : > { %404 = vmatpush.bf16.msra.mxu0 %v677_v5  ;;  %699 = vmatpush.bf16.msra.mxu1 %v677_v5 }
  0x60   : > { %700 = vmatpush.bf16.msra.mxu2 %v677_v5  ;;  %701 = vmatpush.bf16.msra.mxu3 %v677_v5 }
  0x63   : > { %405 = vmatpush.bf16.msra.mxu0 %v676_v8  ;;  %702 = vmatpush.bf16.msra.mxu1 %v676_v8 }
  0x64   : > { %703 = vmatpush.bf16.msra.mxu2 %v676_v8  ;;  %704 = vmatpush.bf16.msra.mxu3 %v676_v8 }
  0x67   : > { %406 = vmatpush.bf16.msra.mxu0 %v675_v28  ;;  %705 = vmatpush.bf16.msra.mxu1 %v675_v28 }
  0x68   : > { %706 = vmatpush.bf16.msra.mxu2 %v675_v28  ;;  %707 = vmatpush.bf16.msra.mxu3 %v675_v28 }
  0x6a   : > { %407 = vmatmul.bf16.vlgmr.msra.gmra.mxu0 %v327_v32  ;;  %417 = vmatmul.bf16.vlgmr.msra.gmra.mxu1 %v329_v33 }
  0x6b   : > { %427 = vmatmul.bf16.vlgmr.msra.gmra.mxu2 %v331_v34  ;;  %437 = vmatmul.bf16.vlgmr.msra.gmra.mxu3 %v333_v35 }
  0x7a   : > { %412 = vmatmul.bf16.gmra.mxu0 %v328_v60  ;;  %422 = vmatmul.bf16.gmra.mxu1 %v330_v61 }
  0x7b   : > { %432 = vmatmul.bf16.gmra.mxu2 %v332_v62  ;;  %442 = vmatmul.bf16.gmra.mxu3 %v334_v63 }
  0xe7   : > { %v408_v1 = vpop.f32.mrf.mxu0  ;;  %v418_v2 = vpop.f32.mrf.mxu1 }
  0xe8   : > { %v448_v3 = vmul.f32 2.0, %v408_v1  ;;  %v452_v4 = vmul.f32 2.0, %v418_v2 }
  0xea   : > { %v468_v5 = vadd.f32 %v1152_v0, %v448_v3  ;;  %v472_v6 = vadd.f32 %v1152_v0, %v452_v4 }
  0xec   : > { %484 = vst [vmem:[%s1157_s11] sm:$0xff] %v468_v5 }
  0xed   : > { %488 = vst [vmem:[%s1157_s11 + $0x20] sm:$0xff] %v472_v6 }
  0xee   : > { %v428_v7 = vpop.f32.mrf.mxu2  ;;  %v438_v8 = vpop.f32.mrf.mxu3 }
  0xef   : > { %v456_v9 = vmul.f32 2.0, %v428_v7  ;;  %v460_v10 = vmul.f32 2.0, %v438_v8  ;;  %v410_v11 = vpop.f32.mrf.mxu0  ;;  %v420_v12 = vpop.f32.mrf.mxu1 }
  0xf0   : > { %v449_v13 = vmul.f32 2.0, %v410_v11  ;;  %v453_v14 = vmul.f32 2.0, %v420_v12 }
  0xf1   : > { %v476_v15 = vadd.f32 %v1152_v0, %v456_v9  ;;  %v480_v16 = vadd.f32 %v1152_v0, %v460_v10 }
  0xf2   : > { %v469_v17 = vadd.f32 %v1152_v0, %v449_v13  ;;  %v473_v18 = vadd.f32 %v1152_v0, %v453_v14 }
  0xf3   : > { %492 = vst [vmem:[%s1157_s11 + $0x40] sm:$0xff] %v476_v15 }
  0xf4   : > { %496 = vst [vmem:[%s1157_s11 + $0x60] sm:$0xff] %v480_v16 }
  0xf5   : > { %485 = vst [vmem:[%s1157_s11 + $0x8] sm:$0xff] %v469_v17 }
  0xf6   : > { %489 = vst [vmem:[%s1157_s11 + $0x28] sm:$0xff] %v473_v18  ;;  %v430_v19 = vpop.f32.mrf.mxu2  ;;  %v440_v20 = vpop.f32.mrf.mxu3 }
  0xf7   : > { %v457_v21 = vmul.f32 2.0, %v430_v19  ;;  %v461_v22 = vmul.f32 2.0, %v440_v20  ;;  %v413_v23 = vpop.f32.mrf.mxu0  ;;  %v423_v24 = vpop.f32.mrf.mxu1 }
  0xf8   : > { %v450_v25 = vmul.f32 2.0, %v413_v23  ;;  %v454_v26 = vmul.f32 2.0, %v423_v24 }
  0xf9   : > { %v477_v27 = vadd.f32 %v1152_v0, %v457_v21  ;;  %v481_v28 = vadd.f32 %v1152_v0, %v461_v22 }
  0xfa   : > { %v470_v29 = vadd.f32 %v1152_v0, %v450_v25  ;;  %v474_v30 = vadd.f32 %v1152_v0, %v454_v26 }
  0xfb   : > { %493 = vst [vmem:[%s1157_s11 + $0x48] sm:$0xff] %v477_v27 }
  0xfc   : > { %497 = vst [vmem:[%s1157_s11 + $0x68] sm:$0xff] %v481_v28 }
  0xfd   : > { %486 = vst [vmem:[%s1157_s11 + $0x10] sm:$0xff] %v470_v29 }
  0xfe   : > { %490 = vst [vmem:[%s1157_s11 + $0x30] sm:$0xff] %v474_v30  ;;  %v433_v31 = vpop.f32.mrf.mxu2  ;;  %v443_v32 = vpop.f32.mrf.mxu3 }
  0xff   : > { %v458_v33 = vmul.f32 2.0, %v433_v31  ;;  %v462_v34 = vmul.f32 2.0, %v443_v32  ;;  %v415_v35 = vpop.f32.mrf.mxu0  ;;  %v425_v36 = vpop.f32.mrf.mxu1 }
 0x100   : > { %v451_v37 = vmul.f32 2.0, %v415_v35  ;;  %v455_v38 = vmul.f32 2.0, %v425_v36 }
 0x101   : > { %v478_v39 = vadd.f32 %v1152_v0, %v458_v33  ;;  %v482_v40 = vadd.f32 %v1152_v0, %v462_v34 }
 0x102   : > { %v471_v41 = vadd.f32 %v1152_v0, %v451_v37  ;;  %v475_v42 = vadd.f32 %v1152_v0, %v455_v38 }
 0x103   : > { %494 = vst [vmem:[%s1157_s11 + $0x50] sm:$0xff] %v478_v39 }
 0x104   : > { %498 = vst [vmem:[%s1157_s11 + $0x70] sm:$0xff] %v482_v40 }
 0x105   : > { %487 = vst [vmem:[%s1157_s11 + $0x18] sm:$0xff] %v471_v41 }
 0x106   : > { %491 = vst [vmem:[%s1157_s11 + $0x38] sm:$0xff] %v475_v42  ;;  %v435_v43 = vpop.f32.mrf.mxu2  ;;  %v445_v44 = vpop.f32.mrf.mxu3 }
 0x107   : > { %v459_v45 = vmul.f32 2.0, %v435_v43  ;;  %v463_v46 = vmul.f32 2.0, %v445_v44 }
 0x109   : > { %v479_v47 = vadd.f32 %v1152_v0, %v459_v45  ;;  %v483_v48 = vadd.f32 %v1152_v0, %v463_v46 }
 0x10b   : > { %495 = vst [vmem:[%s1157_s11 + $0x58] sm:$0xff] %v479_v47 }
 0x10c   : > { %499 = vst [vmem:[%s1157_s11 + $0x78] sm:$0xff] %v483_v48 }
 0x10d   : > { %894 = shalt.err (!%p891_p11)
}
 0x10e   : > { %s948_s8 = smov 128   ;;  %s949_s26 = smov 8  }
 0x10f   : > { %716 = dma.vmem_to_hbm [thread:$0]  (%p1042_p7), %s514_s19, 2048, %s516_s7, %s501_s13, %s948_s8, %s948_s8, %s949_s26  }
 0x110 PF: > { %s530_s27 = sand.u32 1, %s929_s15   ;;  %p1238_p12 = scmp.ge.s32.totalorder %s941_s18, 2 }
 0x111   : > { %s531_s6 = scalar_lea.sflag [#allocation4], %s530_s27 }
 0x112   : > { %p730_p13 = pnand %p1238_p12, %p1010_p6 }
 0x114   : > { %p731_p0 = pneg %p730_p13 }
 0x116   : > { %924 = dma.done.wait (%p731_p0), %s531_s6, 2048  }
 0x117   : > { %926 = vsyncadd (%p731_p0), %s531_s6, 4294965248  ;;  %s1239_s21 = sld [smem:[#allocation13_spill]]  ;;  %p20_p3 = scmp.ge.s32.totalorder %s1028_s29, 4  }
 0x118   : > { %s1240_s15 = smov %s933_s16  ;;  %s1241_s16 = smov %s937_s17 }
 0x119   : > { %s1243_s18 = smov %s1028_s29  ;;  %22 = sbr.rel (!%p20_p3) target bundleno = 10 (0xa), region = 98 }
 0x11d   : > { %s1242_s17 = smov %s1239_s21 }
 0x11e   :  { %537 = vsyncpa [#allocation3], 1 }
 0x11f   :  { %539 = vsyncpa [#allocation3 + $0x1], 1 }
 0x120   :  { %540 = vsyncpa [#allocation6], 1 }
 0x121   :  { %542 = vsyncpa [#allocation6 + $0x1], 1 }
 0x122   :  { %543 = vsyncpa [#allocation4], 1 }
 0x123   :  { %545 = vsyncpa [#allocation4 + $0x1], 1 }

</bundles_post_ra>
